<compile_context>
chip_gen: v7x
topology: tpu7x:2x2x1
jax: 0.10.0
libtpu: 0.0.40
codegen_flags: <defaults>
</compile_context>

<pallas_src>
import functools

import jax
import jax.numpy as jnp
from jax.experimental import pallas as pl
from jax.experimental.pallas import tpu as pltpu

HIDDEN_LOGICAL = 100   # PyTorch module's hidden width
HIDDEN_PADDED = 128    # lane-aligned hidden width used by the kernel
LANE = 128


def _round_up(x, m):
    return ((x + m - 1) // m) * m


def _sublane_multiple(dtype):
    # Min second-to-last block dim: f32 -> 8, bf16 -> 16, int8/fp8 -> 32.
    return max(8, 32 // jnp.dtype(dtype).itemsize)


def _vmem_capacity_bytes():
    try:
        return int(pltpu.get_tpu_info().vmem_capacity_bytes)
    except Exception:
        return 64 * 1024 * 1024   # conservative fallback (v7x per-TC physical VMEM)


def _mlp_kernel(x_ref, w1_ref, b1_ref, w2_ref, b2_ref, o_ref):
    # Per batch tile: (x @ W1 + b1) -> ReLU -> (@ W2 + b2).
    # Both matmuls hit the MXU with f32 accumulation; bias/ReLU epilogue in f32.
    h = jnp.dot(x_ref[...], w1_ref[...], preferred_element_type=jnp.float32)
    h = jnp.maximum(h + b1_ref[...], 0.0)
    y = jnp.dot(h.astype(w2_ref.dtype), w2_ref[...],
                preferred_element_type=jnp.float32)
    o_ref[...] = (y + b2_ref[...]).astype(o_ref.dtype)      # lane-dense store


def _pick_tile_b(B, in_f, out_p, dtype, stream_budget_bytes, requested=None):
    itemsize = jnp.dtype(dtype).itemsize
    sub = _sublane_multiple(dtype)
    bytes_per_row = (in_f + out_p) * itemsize
    # Rows allowed by the double-buffered streaming (x + out) VMEM budget.
    cap = max(sub, (stream_budget_bytes // (2 * bytes_per_row)) // sub * sub)
    if requested is not None:
        tile = max(sub, (min(requested, cap) // sub) * sub)
        return tile if tile < B else B          # full-dim block if tile covers batch
    if B <= cap and B < 256:
        return B                                # single full-batch tile (tiny batch)
    # >= 2 tiles (v7x megacore) with ~512-1024 rows/tile (HBM-roofline sweet spot).
    tile = min(cap, 1024, _round_up(pl.cdiv(B, 2), sub))
    return max(sub, (tile // sub) * sub)


def regression_linear_forward(x, w1_p, b1_p, w2_p, b2_p, out_features, *,
                              tile_b=None, use_pallas=None):
    """x: [B, in_features] -> [B, out_features].

    w1_p: [in_features, 128]   (compute dtype: f32 or bf16)
    b1_p: [1, 128]             (float32 — epilogue stays f32)
    w2_p: [128, out_p]         (compute dtype; out_p = round_up(out_features, 128))
    b2_p: [1, out_p]           (float32)
    """
    B, in_f = x.shape
    hidden_p = w1_p.shape[1]
    out_p = w2_p.shape[1]
    compute_dtype = w1_p.dtype
    x = x.astype(compute_dtype)
    itemsize = jnp.dtype(compute_dtype).itemsize

    if use_pallas is None:
        use_pallas = B >= 256          # small problems: fused XLA beats kernel launch
    if not use_pallas:
        h = jnp.maximum(
            jnp.dot(x, w1_p, preferred_element_type=jnp.float32) + b1_p, 0.0)
        y = jnp.dot(h.astype(compute_dtype), w2_p,
                    preferred_element_type=jnp.float32) + b2_p
        y = y.astype(compute_dtype)
        return y if out_p == out_features else y[:, :out_features]

    weight_bytes = (w1_p.size * itemsize + w2_p.size * itemsize
                    + b1_p.size * 4 + b2_p.size * 4)
    vmem_cap = _vmem_capacity_bytes()
    # ~3/8 of physical VMEM for the streaming tiles (≈24 MiB v7x, ≈48 MiB v5e/v6e).
    stream_budget = max(4 << 20, (vmem_cap * 3) // 8 - weight_bytes)
    tile_b = _pick_tile_b(B, in_f, out_p, compute_dtype, stream_budget, tile_b)
    grid = (pl.cdiv(B, tile_b),)

    stream_bytes = 2 * tile_b * (in_f + out_p) * itemsize   # double-buffered x + out
    vmem_need = weight_bytes + stream_bytes + (8 << 20)     # + scratch headroom
    vmem_limit = min(int(vmem_cap * 0.9), max(vmem_need, 32 << 20))

    flops = 2 * B * (in_f * hidden_p + hidden_p * out_p)
    bytes_accessed = B * in_f * itemsize + B * out_p * itemsize + weight_bytes

    def resident(shape):
        # Constant block index -> fetched once; single-buffer to free VMEM.
        return pl.BlockSpec(shape, lambda i: (0, 0), pipeline_mode=pl.Buffered(1))

    out = pl.pallas_call(
        _mlp_kernel,
        out_shape=jax.ShapeDtypeStruct((B, out_p), compute_dtype),
        grid_spec=pltpu.PrefetchScalarGridSpec(
            num_scalar_prefetch=0,
            grid=grid,
            in_specs=[
                pl.BlockSpec((tile_b, in_f), lambda i: (i, 0)),  # x: streamed over batch
                resident((in_f, hidden_p)),                      # w1: VMEM-resident
                resident((1, hidden_p)),                         # b1 (f32)
                resident((hidden_p, out_p)),                     # w2
                resident((1, out_p)),                            # b2 (f32)
            ],
            out_specs=pl.BlockSpec((tile_b, out_p), lambda i: (i, 0)),
        ),
        compiler_params=pltpu.CompilerParams(
            dimension_semantics=("parallel",),   # shard batch tiles across TCs (v7x)
            vmem_limit_bytes=vmem_limit,
        ),
        cost_estimate=pl.CostEstimate(
            flops=flops, transcendentals=0, bytes_accessed=bytes_accessed),
    )(x, w1_p, b1_p, w2_p, b2_p)

    # Column slice only when out_features was padded (rows are already exact: no batch pad).
    return out if out_p == out_features else out[:, :out_features]


def init_params(key, in_features, out_features, dtype=jnp.float32):
    """True (unpadded) params, transposed for x @ W, PyTorch nn.Linear-style init."""
    k1, k2, k3, k4 = jax.random.split(key, 4)
    s1 = 1.0 / jnp.sqrt(in_features)
    s2 = 1.0 / jnp.sqrt(HIDDEN_LOGICAL)
    w1 = jax.random.uniform(k1, (in_features, HIDDEN_LOGICAL), dtype, -s1, s1)
    b1 = jax.random.uniform(k2, (HIDDEN_LOGICAL,), dtype, -s1, s1)
    w2 = jax.random.uniform(k3, (HIDDEN_LOGICAL, out_features), dtype, -s2, s2)
    b2 = jax.random.uniform(k4, (out_features,), dtype, -s2, s2)
    return w1, b1, w2, b2


def pad_params(w1, b1, w2, b2, *, compute_dtype=jnp.float32):
    """Lane-align: hidden 100 -> 128, out -> multiple of 128 (zero pad, exact).
    Weights cast to compute_dtype (bf16 halves resident + HBM bytes); biases stay f32."""
    out_f = w2.shape[1]
    out_p = _round_up(out_f, LANE)
    dh = HIDDEN_PADDED - w1.shape[1]
    do = out_p - out_f
    w1_p = jnp.pad(w1, ((0, 0), (0, dh))).astype(compute_dtype)
    b1_p = jnp.pad(b1.reshape(1, -1), ((0, 0), (0, dh))).astype(jnp.float32)
    w2_p = jnp.pad(w2, ((0, dh), (0, do))).astype(compute_dtype)
    b2_p = jnp.pad(b2.reshape(1, -1), ((0, 0), (0, do))).astype(jnp.float32)
    return w1_p, b1_p, w2_p, b2_p


if __name__ == "__main__":
    B, in_features, out_features = 24, 32, 16

    key = jax.random.PRNGKey(0)
    kx, kp = jax.random.split(key)
    x = jax.random.normal(kx, (B, in_features), jnp.float32)
    w1, b1, w2, b2 = init_params(kp, in_features, out_features)
    ref = jnp.maximum(x @ w1 + b1, 0.0) @ w2 + b2

    # f32 path; tile_b=16 forces a 2-tile grid with a ragged, masked-writeback last tile.
    p32 = pad_params(w1, b1, w2, b2, compute_dtype=jnp.float32)
    fwd = jax.jit(functools.partial(
        regression_linear_forward, out_features=out_features,
        tile_b=16, use_pallas=True))
    out32 = jax.block_until_ready(fwd(x, *p32))
    assert out32.shape == (B, out_features)
    assert jnp.allclose(out32, ref, atol=1e-5, rtol=1e-5)

    # bf16 streaming path (f32 MXU accumulation + f32 epilogue) — looser tolerance.
    pbf = pad_params(w1, b1, w2, b2, compute_dtype=jnp.bfloat16)
    outbf = jax.block_until_ready(fwd(x, *pbf))
    assert outbf.shape == (B, out_features)
    assert jnp.allclose(outbf.astype(jnp.float32), ref, atol=5e-2, rtol=5e-2)

    print("KERNEL_OK")
</pallas_src>

<mosaic_0001>
module attributes {stable_mosaic.version = 11 : i64} {
  func.func @_mlp_kernel(%arg0: i32, %arg1: memref<16x32xf32, #tpu.memory_space<vmem>>, %arg2: memref<32x128xf32, #tpu.memory_space<vmem>>, %arg3: memref<1x128xf32, #tpu.memory_space<vmem>>, %arg4: memref<128x128xf32, #tpu.memory_space<vmem>>, %arg5: memref<1x128xf32, #tpu.memory_space<vmem>>, %arg6: memref<16x128xf32, #tpu.memory_space<vmem>>) attributes {dimension_semantics = [#tpu.dimension_semantics<parallel>], iteration_bounds = array<i64: 2>, scalar_prefetch = 0 : i64, scratch_operands = 0 : i64, tpu.core_type = #tpu.core_type<tc>, window_params = [{transform_indices = @transform_0, window_bounds = array<i64: 16, 32>}, {pipeline_mode = #tpu.pipeline_mode<synchronous>, transform_indices = @transform_1, window_bounds = array<i64: 32, 128>}, {pipeline_mode = #tpu.pipeline_mode<synchronous>, transform_indices = @transform_2, window_bounds = array<i64: 1, 128>}, {pipeline_mode = #tpu.pipeline_mode<synchronous>, transform_indices = @transform_3, window_bounds = array<i64: 128, 128>}, {pipeline_mode = #tpu.pipeline_mode<synchronous>, transform_indices = @transform_4, window_bounds = array<i64: 1, 128>}, {transform_indices = @transform_5, window_bounds = array<i64: 16, 128>}]} {
    %c0 = arith.constant 0 : index
    %c0_0 = arith.constant 0 : index
    %0 = vector.load %arg1[%c0, %c0_0] : memref<16x32xf32, #tpu.memory_space<vmem>>, vector<16x32xf32>
    %c0_1 = arith.constant 0 : index
    %c0_2 = arith.constant 0 : index
    %1 = vector.load %arg2[%c0_1, %c0_2] : memref<32x128xf32, #tpu.memory_space<vmem>>, vector<32x128xf32>
    %cst = arith.constant dense<0.000000e+00> : vector<16x128xf32>
    %2 = tpu.matmul %0, %1, %cst {dimension_numbers = #tpu.dot_dimension_numbers<[1], [0], [0], [1], [0, 0, 1, 1], [], []>} : vector<16x32xf32>, vector<32x128xf32>, vector<16x128xf32> -> vector<16x128xf32>
    %c0_3 = arith.constant 0 : index
    %c0_4 = arith.constant 0 : index
    %3 = vector.load %arg3[%c0_3, %c0_4] : memref<1x128xf32, #tpu.memory_space<vmem>>, vector<1x128xf32>
    %4 = vector.broadcast %3 : vector<1x128xf32> to vector<16x128xf32>
    %5 = arith.addf %2, %4 : vector<16x128xf32>
    %cst_5 = arith.constant 0.000000e+00 : f32
    %6 = vector.broadcast %cst_5 : f32 to vector<16x128xf32>
    %7 = arith.maximumf %5, %6 : vector<16x128xf32>
    %c0_6 = arith.constant 0 : index
    %c0_7 = arith.constant 0 : index
    %8 = vector.load %arg4[%c0_6, %c0_7] : memref<128x128xf32, #tpu.memory_space<vmem>>, vector<128x128xf32>
    %cst_8 = arith.constant dense<0.000000e+00> : vector<16x128xf32>
    %9 = tpu.matmul %7, %8, %cst_8 {dimension_numbers = #tpu.dot_dimension_numbers<[1], [0], [0], [1], [0, 0, 1, 1], [], []>} : vector<16x128xf32>, vector<128x128xf32>, vector<16x128xf32> -> vector<16x128xf32>
    %c0_9 = arith.constant 0 : index
    %c0_10 = arith.constant 0 : index
    %10 = vector.load %arg5[%c0_9, %c0_10] : memref<1x128xf32, #tpu.memory_space<vmem>>, vector<1x128xf32>
    %11 = vector.broadcast %10 : vector<1x128xf32> to vector<16x128xf32>
    %12 = arith.addf %9, %11 : vector<16x128xf32>
    %c0_11 = arith.constant 0 : index
    %c0_12 = arith.constant 0 : index
    %13 = vector.load %arg6[%c0_11, %c0_12] : memref<16x128xf32, #tpu.memory_space<vmem>>, vector<16x128xf32>
    tpu.vector_store %arg6[%c0_11, %c0_12], %12 {strides = array<i32>} : memref<16x128xf32, #tpu.memory_space<vmem>>, vector<16x128xf32>,
    return
  }
  func.func @transform_0(%arg0: i32) -> (i32, i32) {
    %c0_i32 = arith.constant 0 : i32
    %c0_i32_0 = arith.constant 0 : i32
    return %arg0, %c0_i32 : i32, i32
  }
  func.func @transform_1(%arg0: i32) -> (i32, i32) {
    %c0_i32 = arith.constant 0 : i32
    %c0_i32_0 = arith.constant 0 : i32
    %c0_i32_1 = arith.constant 0 : i32
    return %c0_i32, %c0_i32_0 : i32, i32
  }
  func.func @transform_2(%arg0: i32) -> (i32, i32) {
    %c0_i32 = arith.constant 0 : i32
    %c0_i32_0 = arith.constant 0 : i32
    %c0_i32_1 = arith.constant 0 : i32
    return %c0_i32, %c0_i32_0 : i32, i32
  }
  func.func @transform_3(%arg0: i32) -> (i32, i32) {
    %c0_i32 = arith.constant 0 : i32
    %c0_i32_0 = arith.constant 0 : i32
    %c0_i32_1 = arith.constant 0 : i32
    return %c0_i32, %c0_i32_0 : i32, i32
  }
  func.func @transform_4(%arg0: i32) -> (i32, i32) {
    %c0_i32 = arith.constant 0 : i32
    %c0_i32_0 = arith.constant 0 : i32
    %c0_i32_1 = arith.constant 0 : i32
    return %c0_i32, %c0_i32_0 : i32, i32
  }
  func.func @transform_5(%arg0: i32) -> (i32, i32) {
    %c0_i32 = arith.constant 0 : i32
    %c0_i32_0 = arith.constant 0 : i32
    return %arg0, %c0_i32 : i32, i32
  }
}

</mosaic_0001>

<bundles_post_ra>
// kernel: regression_linear_forward.1
= control target key start
LH: loop header
LB: loop body
LE: loop exit
PB: predicated region body
PF: predicated region fallthrough
CT: control target
= control target key end

     0   :  { %10 = vsyncpa [#allocation3], 0  ;;  %s1458_s0 = inlined_call_operand.hbm [shape: f32[24,32], index: 0, kind: input, shape index: {}]   ;;  %s1459_s1 = inlined_call_operand.hbm [shape: f32[32,128], index: 1, kind: input, shape index: {}]   ;;  %s1460_s2 = inlined_call_operand.vmem [shape: f32[1,128], index: 2, kind: input, shape index: {}]   ;;  %s1461_s3 = inlined_call_operand.hbm [shape: f32[128,128], index: 3, kind: input, shape index: {}]   ;;  %s1462_s4 = inlined_call_operand.vmem [shape: f32[1,128], index: 4, kind: input, shape index: {}]   ;;  %s1463_s5 = inlined_call_operand.vmem [shape: f32[24,128], index: 5, kind: output, shape index: {}]  }
   0x1   :  { %12 = vsyncpa [#allocation3 + $0x1], 0 }
   0x2   :  { %13 = vsyncpa [#allocation5], 0  ;;  %s1229_s18 = smov 0   ;;  %s1231_s19 = smov 0  }
   0x3   :  { %s1233_s20 = smov 0   ;;  %s1235_s21 = smov 0  }
   0x4 LB: > { %s1248_s22 = sadd.s32 4294967295, %s1158_s21   ;;  %s1251_s23 = sadd.s32 1, %s1158_s21   ;;  %s1158_s21 = sphi %s1235_s21, %s1481_s21   ;;  %s1154_s20 = sphi %s1233_s20, %s1480_s20   ;;  %s1150_s19 = sphi %s1231_s19, %s1479_s19   ;;  %s1146_s18 = sphi %s1229_s18, %s1478_s18  }
   0x5   : > { %s23_s24 = ssub.s32 %s1158_s21, %s1251_s23  ;;  %s26_s25 = sadd.s32 1, %s1154_s20 }
   0x6   : > { %p24_p0 = scmp.eq.s32.totalorder %s23_s24, 0  ;;  %p33_p1 = scmp.ne.s32.totalorder %s1154_s20, %s1150_s19 }
   0x7   : > { %p34_p2 = scmp.eq.s32.totalorder %s1158_s21, 0  ;;  %p39_p3 = scmp.ne.s32.totalorder %s1150_s19, %s1146_s18 }
   0x8   : > { %s1261_s26 = scalar_select %p24_p0, %s1154_s20, %s26_s25  }
   0x9   : > { %p1263_p4 = por %p34_p2, %p33_p1  ;;  %p1464_p5 = scmp.eq.s32.totalorder %s1248_s22, 0 }
   0xa   : > { %p147_p6 = scmp.eq.s32.totalorder %s1248_s22, 1  ;;  %p731_p7 = scmp.ge.s32.totalorder %s1158_s21, 1 }
   0xb   : > { %s1467_s27 = scalar_select %p1263_p4, 1, 0 }
   0xc   : > { %p1272_p8 = por %p1464_p5, %p39_p3  ;;  %p160_p9 = scmp.lt.s32.totalorder %s1158_s21, 3 }
   0xd   : > { %p1277_p10 = por %p147_p6, %p33_p1  ;;  %s1192_s6 = smov [#allocation4]  }
   0xe   : > { %s1468_s28 = scalar_select %p1272_p8, 1, 0 }
   0xf   : > { %s1469_s29 = scalar_select %p1277_p10, 1, 0 }
  0x10   : > { %p1281_p11 = pnand %p731_p7, %p160_p9  ;;  %s172_s7 = sshll.u32 %s1192_s6, 4  ;;  %s173_s7 = int_to_ptr.vmem [resolvable:$true] %s172_s7 }
  0x11   : > { %s1193_s9 = smov [#allocation6]   ;;  %s1004_s13 = scalar_lea.hbm %s1459_s1, 512 }
  0x12   : > { %s1470_s30 = scalar_select %p1281_p11, 1, 0 }
  0x13   : > { %p891_p12 = pneg %p1281_p11  ;;  %s188_s10 = sshll.u32 %s1193_s9, 4  ;;  %s1293_s10 = int_to_ptr.vmem [resolvable:$true] %s188_s10 }
  0x14   : > { %p1005_p0 = scmp.ne.s32.totalorder %s1459_s1, %s1004_s13  ;;  %p1011_p6 = scmp.lt.u32.totalorder %s1004_s13, %s1459_s1 }
  0x15   : > { %p1289_p13 = pnand %p891_p12, %p1464_p5 }
  0x17   : > { %p1006_p1 = pneg %p1289_p13 }
  0x19   : > { %p1007_p2 = pnand %p1006_p1, %p1005_p0 }
  0x1b   : > { %p1008_p3 = pneg %p1007_p2 }
  0x1d   : > { %p1013_p7 = pnand %p1011_p6, %p1008_p3 }
  0x1f   : > { %1016 = shalt.err (!%p1013_p7)
}
  0x20   : > { %s1017_s18 = scalar_lea.vmem %s173_s7, 512  ;;  %p1025_p10 = scmp.lt.s32.totalorder %s173_s7, %s173_s7 }
  0x21   : > { %p1018_p9 = scmp.ne.s32.totalorder %s173_s7, %s1017_s18  ;;  %p1026_p8 = scmp.lt.s32.totalorder %s1017_s18, %s1017_s18 }
  0x23   : > { %p1020_p12 = pnand %p1018_p9, %p1006_p1  ;;  %p1027_p11 = por %p1026_p8, %p1025_p10 }
  0x25   : > { %p1021_p5 = pneg %p1020_p12 }
  0x27   : > { %p1028_p4 = pnand %p1027_p11, %p1021_p5 }
  0x29   : > { %1031 = shalt.err (!%p1028_p4)
}
  0x2a   : > { %s1194_s24 = smov 128   ;;  %s1195_s25 = smov 8  }
  0x2b   : > { %894 = dma.hbm_to_vmem [thread:$0]  (!%p1289_p13), %s1459_s1, 512, %s173_s7, [#allocation5], %s1194_s24, %s1194_s24, %s1195_s25  }
  0x2c   : > { %s1032_s13 = scalar_lea.hbm %s1461_s3, 2048 }
  0x2d   : > { %p1033_p0 = scmp.ne.s32.totalorder %s1461_s3, %s1032_s13  ;;  %p1039_p8 = scmp.lt.u32.totalorder %s1032_s13, %s1461_s3 }
  0x2f   : > { %p1035_p4 = pnand %p1033_p0, %p1006_p1 }
  0x31   : > { %p1036_p5 = pneg %p1035_p4 }
  0x33   : > { %p1041_p10 = pnand %p1039_p8, %p1036_p5 }
  0x35   : > { %1044 = shalt.err (!%p1041_p10)
}
  0x36   : > { %s1045_s7 = scalar_lea.vmem %s1293_s10, 2048  ;;  %p1053_p6 = scmp.lt.s32.totalorder %s1293_s10, %s1293_s10 }
  0x37   : > { %p1046_p11 = scmp.ne.s32.totalorder %s1293_s10, %s1045_s7  ;;  %p1054_p7 = scmp.lt.s32.totalorder %s1045_s7, %s1045_s7 }
  0x39   : > { %p1048_p2 = pnand %p1046_p11, %p1006_p1  ;;  %p1055_p9 = por %p1054_p7, %p1053_p6 }
  0x3b   : > { %p1049_p3 = pneg %p1048_p2 }
  0x3d   : > { %p1056_p12 = pnand %p1055_p9, %p1049_p3 }
  0x3f   : > { %1059 = shalt.err (!%p1056_p12)
}
  0x40   : > { %897 = dma.hbm_to_vmem [thread:$0]  (!%p1289_p13), %s1461_s3, 2048, %s1293_s10, [#allocation5], %s1194_s24, %s1194_s24, %s1195_s25  }
  0x41   : > { %p734_p0 = scmp.ge.s32.totalorder %s1158_s21, 2 }
  0x42   : > { %p1472_p4 = scmp.ne.s32.totalorder (!%p734_p0), %s1467_s27, 0 }
  0x43   : > { %201 = sbr.rel (%p734_p0) target bundleno = 109 (0x6d), region = 32 }
  0x4a   : > { %204 = sbr.rel (!%p1472_p4) target bundleno = 109 (0x6d), region = 36  ;;  %s205_s9 = sand.u32 (%p1472_p4), 1, %s1154_s20  }
  0x4b   : > { %s736_s11 = sshll.u32 (%p1472_p4), %s1158_s21, 1  ;;  %s735_s12 = sshll.u32 (%p1472_p4), %s205_s9, 4 }
  0x4c   : > { %s211_s13 = ssub.s32 (%p1472_p4), 3, %s736_s11  ;;  %s1350_s15 = scalar_lea.sflag (%p1472_p4), [#allocation3], %s205_s9 }
  0x4d   : > { %p212_p1 = scmp.lt.s32.totalorder (%p1472_p4), %s211_s13, 2  ;;  %s209_s10 = scalar_lea.vmem (%p1472_p4), [#allocation2], %s735_s12 }
  0x51   : > { %s1483_s13 = smov (!%p212_p1, %s211_s13), 2 }
  0x52   : > { %s1347_s8 = sshll.u32 %s1483_s13, 7 }
  0x53   : > { %s216_s14 = ssub.s32 256, %s1347_s8 }
  0x54   : > { %217 = vsyncadd %s1350_s15, %s216_s14  ;;  %p738_p13 = scmp.ne.s32.totalorder %s1347_s8, 0  ;;  %s768_s27 = sshll.u32 %s1158_s21, 8 }
  0x55   : > { %s1358_s16 = scalar_lea.hbm %s1458_s0, %s768_s27  ;;  %s222_s17 = sshll.u32 %s209_s10, 4  ;;  %s1360_s17 = int_to_ptr.vmem [resolvable:$true] %s222_s17 }
  0x56   : > { %s1060_s7 = scalar_lea.hbm %s1358_s16, %s1347_s8  ;;  %s1064_s21 = scalar_lea.hbm %s1458_s0, 384 }
  0x57   : > { %p1061_p5 = scmp.ne.s32.totalorder %s1358_s16, %s1060_s7  ;;  %p1065_p11 = scmp.lt.u32.totalorder %s1358_s16, %s1458_s0 }
  0x58   : > { %p1066_p2 = scmp.lt.u32.totalorder %s1064_s21, %s1060_s7  ;;  %p1068_p6 = scmp.lt.u32.totalorder %s1060_s7, %s1358_s16 }
  0x59   : > { %p1062_p8 = pnand %p1061_p5, %p738_p13 }
  0x5a   : > { %p1067_p3 = por %p1066_p2, %p1065_p11 }
  0x5b   : > { %p1063_p10 = pneg %p1062_p8 }
  0x5c   : > { %p1069_p7 = por %p1068_p6, %p1067_p3 }
  0x5e   : > { %p1070_p9 = pnand %p1069_p7, %p1063_p10 }
  0x60   : > { %1073 = shalt.err (!%p1070_p9)
}
  0x61   : > { %s1074_s12 = scalar_lea.vmem %s1360_s17, %s1347_s8  ;;  %s1196_s13 = smov [#allocation2]  }
  0x62   : > { %p1075_p12 = scmp.ne.s32.totalorder %s1360_s17, %s1074_s12  ;;  %s1078_s14 = sshll.u32 %s1196_s13, 4  ;;  %s1079_s14 = int_to_ptr.vmem [resolvable:$false] %s1078_s14 }
  0x63   : > { %s1080_s10 = scalar_lea.vmem %s1079_s14, 512  ;;  %p1081_p1 = scmp.lt.s32.totalorder %s1360_s17, %s1079_s14 }
  0x64   : > { %p1076_p0 = pnand %p1075_p12, %p738_p13  ;;  %p1082_p5 = scmp.lt.s32.totalorder %s1080_s10, %s1074_s12 }
  0x66   : > { %p1077_p4 = pneg %p1076_p0  ;;  %p1083_p8 = por %p1082_p5, %p1081_p1 }
  0x68   : > { %p1084_p11 = pnand %p1083_p8, %p1077_p4 }
  0x6a   : > { %1087 = shalt.err (!%p1084_p11)
}
  0x6b   : > { %s1197_s27 = smov 128   ;;  %s1198_s24 = smov 8  }
  0x6c   : > { %228 = dma.hbm_to_vmem [thread:$0]  (%p738_p13), %s1358_s16, %s1347_s8, %s1360_s17, %s1350_s15, %s1197_s27, %s1197_s27, %s1198_s24  }
  0x6d PF: > { %p1473_p10 = scmp.ne.s32.totalorder %s1470_s30, 0 }
  0x6e   : > { %s236_s25 = sand.u32 (!%p1473_p10), 1, %s1150_s19   ;;  %p1474_p2 = scmp.ne.s32.totalorder (!%p1473_p10), %s1468_s28, 0 }
  0x6f   : > { %234 = sbr.rel (%p1473_p10) target bundleno = 616 (0x268), region = 40  ;;  %s1390_s7 = sshll.u32 (!%p1473_p10), %s236_s25, 4 }
  0x70   : > { %s237_s18 = scalar_lea.sflag (!%p1473_p10), [#allocation3], %s236_s25  ;;  %s240_s6 = scalar_lea.vmem (!%p1473_p10), [#allocation2], %s1390_s7 }
  0x76   : > { %1137 = dma.done.wait (%p1474_p2), %s237_s18, 256  }
  0x77   : > { %1139 = vsyncadd (%p1474_p2), %s237_s18, 4294967040  ;;  %p1475_p13 = scmp.eq.s32.totalorder %s1248_s22, 0 }
  0x79   : > { %1141 = dma.done.wait (%p1475_p13), [#allocation5], 2560   ;;  %p1476_p3 = pmov %p1475_p13 }
  0x7a   : > { %vm297_vm0 = vcmask 261120   ;;  %v286_v0 = vld [vmem:[#allocation4] sm:$0xff]  ;;  %v287_v1 = vld [vmem:[#allocation4 + $0x8] sm:$0xff]  ;;  %v288_v2 = vld [vmem:[#allocation4 + $0x10] sm:$0xff]  ;;  %s1410_s16 = scalar_lea.vmem [#allocation7], %s1390_s7   ;;  %p1477_p6 = scmp.ne.s32.totalorder %s1469_s29, 0 }
  0x7b   : > { %1143 = vsyncadd (%p1476_p3), [#allocation5], 4294964736  ;;  %v842_v3 = vpack.c.bf16 %v287_v1, %v286_v0  ;;  %v289_v4 = vld [vmem:[#allocation4 + $0x18] sm:$0xff]  ;;  %v284_v5 = vld [vmem:[%s240_s6] sm:$0xff]  ;;  %s752_s17 = sshll.u32 (%p1477_p6), %s1248_s22, 1  ;;  %s769_s21 = sshll.u32 (%p1477_p6), %s1248_s22, 4 }
  0x7c   : > { %v846_v6 = vpack.c.bf16 %v289_v4, %v288_v2  ;;  %804 = vmatprep.mubr.msk.f32.mxu0 %vm297_vm0, %v284_v5  ;;  %v381_v7 = vld [vmem:[#allocation6] sm:$0xff]  ;;  %v382_v8 = vld [vmem:[#allocation6 + $0x8] sm:$0xff]  ;;  %v383_v9 = vld [vmem:[#allocation6 + $0x10] sm:$0xff]  ;;  %s489_s9 = ssub.s32 (%p1477_p6), 3, %s752_s17  ;;  %s1421_s13 = scalar_lea.vmem (%p1477_p6), %s1463_s5, %s769_s21  }
  0x7d   : > { %843 = vmatprep.subr.bf16.mxu0 %v842_v3  ;;  %v850_v10 = vpack.c.bf16 %v382_v8, %v381_v7  ;;  %v384_v11 = vld [vmem:[#allocation6 + $0x18] sm:$0xff]  ;;  %v385_v13 = vld [vmem:[#allocation6 + $0x20] sm:$0xff]  ;;  %v386_v14 = vld [vmem:[#allocation6 + $0x28] sm:$0xff]  ;;  %p490_p7 = scmp.lt.s32.totalorder (%p1477_p6), %s489_s9, 2 }
  0x7e   : > { %845 = vmatpush3.bf16.msra.mxu0 %v842_v3  ;;  %v854_v12 = vpack.c.bf16 %v384_v11, %v383_v9  ;;  %v858_v15 = vpack.c.bf16 %v386_v14, %v385_v13  ;;  %v285_v16 = vld [vmem:[%s240_s6 + $0x8] sm:$0xff]  ;;  %v387_v17 = vld [vmem:[#allocation6 + $0x30] sm:$0xff]  ;;  %v389_v20 = vld [vmem:[#allocation6 + $0x40] sm:$0xff] }
  0x7f   : > { %847 = vmatprep.subr.bf16.mxu0 %v846_v6  ;;  %851 = vmatprep.subr.bf16.mxu1 %v850_v10  ;;  %v388_v18 = vld [vmem:[#allocation6 + $0x38] sm:$0xff]  ;;  %v390_v21 = vld [vmem:[#allocation6 + $0x48] sm:$0xff]  ;;  %v391_v23 = vld [vmem:[#allocation6 + $0x50] sm:$0xff] }
  0x80   : > { %853 = vmatpush3.bf16.msra.mxu1 %v850_v10  ;;  %v862_v19 = vpack.c.bf16 %v388_v18, %v387_v17  ;;  %v866_v22 = vpack.c.bf16 %v390_v21, %v389_v20  ;;  %v392_v24 = vld [vmem:[#allocation6 + $0x58] sm:$0xff]  ;;  %v393_v26 = vld [vmem:[#allocation6 + $0x60] sm:$0xff]  ;;  %v394_v27 = vld [vmem:[#allocation6 + $0x68] sm:$0xff] }
  0x81   : > { %855 = vmatprep.subr.bf16.mxu1 %v854_v12  ;;  %v870_v25 = vpack.c.bf16 %v392_v24, %v391_v23  ;;  %v874_v28 = vpack.c.bf16 %v394_v27, %v393_v26  ;;  %v395_v29 = vld [vmem:[#allocation6 + $0x70] sm:$0xff]  ;;  %v396_v30 = vld [vmem:[#allocation6 + $0x78] sm:$0xff]  ;;  %v747_v32 = vld [vmem:[%s1460_s2] ss:$0 sm:$0xff] }
  0x82   : > { %849 = vmatpush3.bf16.msra.mxu0 %v846_v6  ;;  %v878_v31 = vpack.c.bf16 %v396_v30, %v395_v29  ;;  %v750_v39 = vld [vmem:[%s1462_s4] ss:$0 sm:$0xff] }
  0x84   : > { %857 = vmatpush3.bf16.msra.mxu1 %v854_v12 }
  0x85   : > { %805 = vmatmul.mubr.msk.f32.vlgmr.msra.gmra.mrb[0].mxu0 %vm297_vm0, %v285_v16  ;;  %859 = vmatprep.subr.bf16.mxu1 %v858_v15 }
  0x88   : > { %861 = vmatpush3.bf16.msra.mxu1 %v858_v15 }
  0x89   : > { %863 = vmatprep.subr.bf16.mxu1 %v862_v19 }
  0x8c   : > { %865 = vmatpush3.bf16.msra.mxu1 %v862_v19 }
  0x8d   : > { %867 = vmatprep.subr.bf16.mxu1 %v866_v22 }
  0x90   : > { %869 = vmatpush3.bf16.msra.mxu1 %v866_v22 }
  0x91   : > { %871 = vmatprep.subr.bf16.mxu1 %v870_v25 }
  0x94   : > { %873 = vmatpush3.bf16.msra.mxu1 %v870_v25 }
  0x95   : > { %875 = vmatprep.subr.bf16.mxu1 %v874_v28 }
  0x98   : > { %877 = vmatpush3.bf16.msra.mxu1 %v874_v28 }
  0x99   : > { %879 = vmatprep.subr.bf16.mxu1 %v878_v31 }
  0x9c   : > { %881 = vmatpush3.bf16.msra.mxu1 %v878_v31 }
 0x158   : > { %v806_v33 = vpop.f32.mrb[0].mxu0 }
 0x159   : > { %v376_v34 = vadd.f32 %v806_v33, %v747_v32  ;;  %v370_v35 = vpop.f32.mrb[1].mxu0 }
 0x15a   : > { %v371_v36 = vadd.f32 %v747_v32, %v370_v35 }
 0x15b   : > { %v380_v38 = vmax.f32 %v376_v34, 0.0 }
 0x15c   : > { %v379_v37 = vmax.f32 %v371_v36, 0.0 }
 0x15e   : > { %839 = vmatprep.mubr.f32.mxu1 %v379_v37 }
 0x15f   : > { %840 = vmatmul.mubr.f32.vlgmr.msra.gmra.mrb[0].mxu1 %v380_v38 }
 0x230   : > { %487 = sbr.rel (!%p1477_p6) target bundleno = 616 (0x268), region = 56 }
 0x232   : > { %v841_v40 = vpop.f32.mrb[0].mxu1 }
 0x233   : > { %v476_v41 = vadd.f32 %v841_v40, %v750_v39  ;;  %v470_v42 = vpop.f32.mrb[1].mxu1 }
 0x234   : > { %v471_v43 = vadd.f32 %v750_v39, %v470_v42 }
 0x235   : > { %480 = vst [vmem:[%s1410_s16 + $0x8] sm:$0xff] %v476_v41 }
 0x236   : > { %479 = vst [vmem:[%s1410_s16] sm:$0xff] %v471_v43 }
 0x237   : > { %s1485_s9 = smov (!%p490_p7, %s489_s9), 2 }
 0x238   : > { %s753_s14 = sshll.u32 %s1485_s9, 7 }
 0x239   : > { %p756_p9 = scmp.eq.s32.totalorder %s753_s14, 0 }
 0x23a   : > { %s1427_s29 = sshrl.u32 (!%p756_p9), %s1485_s9, 1 }
 0x23b   : > { %498 = sbr.rel (%p756_p9) target bundleno = 616 (0x268), region = 60  ;;  %p757_p12 = scmp.le.s32.totalorder (!%p756_p9), %s1427_s29, 0 }
 0x242   : > { %665 = sbr.rel (%p757_p12) target bundleno = 595 (0x253), region = 142  ;;  %s1160_s22 = smov (!%p757_p12), %s1421_s13  }
 0x243   : > { %s1164_s10 = smov (!%p757_p12), %s1410_s16   ;;  %s1168_s27 = smov (!%p757_p12), 0  }
 0x244   : > { %s1172_s24 = smov (!%p757_p12), 0  }
 0x249 LB: >> { %v562_v44 = vld [vmem:[%s1166_s10] sm:$0xff]  ;;  %v564_v45 = vld [vmem:[%s1166_s10 + $0x8] sm:$0xff]  ;;  %s566_s25 = sadd.s32 1, %s1170_s27  ;;  %s556_s24 = sadd.s32 1, %s1174_s24   ;;  %s1174_s24 = sphi %s1172_s24, %s556_s24   ;;  %s1170_s27 = sphi %s1168_s27, %s1169_s27   ;;  %s1166_s10 = sphi %s1164_s10, %s571_s10   ;;  %s1162_s22 = sphi %s1160_s22, %s572_s22  }
 0x24a   : >> { %563 = vst [vmem:[%s1162_s22] sm:$0xff] %v562_v44  ;;  %565 = vst [vmem:[%s1162_s22 + $0x8] sm:$0xff] %v564_v45  ;;  %p567_p0 = scmp.ge.s32.totalorder %s566_s25, %s1427_s29  ;;  %p555_p4 = scmp.ge.s32.totalorder %s556_s24, %s1427_s29 }
 0x24c   : >> { %s1487_s25 = smov (%p567_p0, %s566_s25), 0  ;;  %558 = sbr.rel (!%p555_p4) target bundleno = 585 (0x249), region = 148 }
 0x24d   : >> { %s758_s7 = sshll.u32 %s1487_s25, 4  ;;  %s1169_s27 = smov %s1487_s25  }
 0x24e   : >> { %s571_s10 = scalar_lea.vmem %s1410_s16, %s758_s7 [#allocation7]   ;;  %s572_s22 = scalar_lea.vmem %s1421_s13, %s758_s7  }
 0x253 PF: > { %s1437_s18 = sand.u32 1, %s1485_s9   ;;  %s770_s6 = sshll.u32 %s1427_s29, 4 }
 0x254   : > { %s577_s28 = scalar_lea.vmem %s1410_s16, %s770_s6 [#allocation7]   ;;  %s579_s30 = scalar_lea.vmem %s1421_s13, %s770_s6  }
 0x255   : > { %p763_p1 = scmp.le.s32.totalorder %s1437_s18, 0 }
 0x256   : > { %s1176_s8 = smov (!%p763_p1), %s579_s30   ;;  %s1180_s15 = smov (!%p763_p1), %s577_s28  }
 0x257   : > { %679 = sbr.rel (%p763_p1) target bundleno = 616 (0x268), region = 153  ;;  %s1184_s17 = smov (!%p763_p1), 0  }
 0x258   : > { %s1188_s21 = smov (!%p763_p1), 0  }
 0x25e LB: >> { %v589_v46 = vld [vmem:[%s1182_s15] sm:$0xff]  ;;  %s591_s9 = sadd.s32 1, %s1186_s17  ;;  %s583_s21 = sadd.s32 1, %s1190_s21   ;;  %s1190_s21 = sphi %s1188_s21, %s583_s21   ;;  %s1186_s17 = sphi %s1184_s17, %s1185_s17   ;;  %s1182_s15 = sphi %s1180_s15, %s596_s15   ;;  %s1178_s8 = sphi %s1176_s8, %s597_s8  }
 0x25f   : >> { %590 = vst [vmem:[%s1178_s8] sm:$0xff] %v589_v46  ;;  %p592_p5 = scmp.ge.s32.totalorder %s591_s9, %s1437_s18  ;;  %p582_p8 = scmp.ge.s32.totalorder %s583_s21, %s1437_s18 }
 0x261   : >> { %s1489_s9 = smov (%p592_p5, %s591_s9), 0  ;;  %585 = sbr.rel (!%p582_p8) target bundleno = 606 (0x25e), region = 159 }
 0x262   : >> { %s764_s16 = sshll.u32 %s1489_s9, 3  ;;  %s1185_s17 = smov %s1489_s9  }
 0x263   : >> { %s596_s15 = scalar_lea.vmem %s577_s28, %s764_s16 [#allocation7]   ;;  %s597_s8 = scalar_lea.vmem %s579_s30, %s764_s16  }
 0x268 PF: > { %p16_p11 = scmp.ge.s32.totalorder %s1251_s23, 4   ;;  %s1478_s18 = smov %s1150_s19 }
 0x269   : > { %s1479_s19 = smov %s1154_s20  ;;  %s1480_s20 = smov %s1261_s26 }
 0x26a   : > { %s1481_s21 = smov %s1251_s23  ;;  %18 = sbr.rel (!%p16_p11) target bundleno = 4 (0x4), region = 170 }
 0x271   :  { %613 = vsyncpa [#allocation3], 1 }
 0x272   :  { %615 = vsyncpa [#allocation3 + $0x1], 1 }
 0x273   :  { %616 = vsyncpa [#allocation5], 1 }

</bundles_post_ra>
